<compile_context>
chip_gen: v6e
topology: v6e:2x2x1
jax: 0.10.0
libtpu: 0.0.40
codegen_flags: <defaults>
</compile_context>

<pallas_src>
import functools

import jax
import jax.numpy as jnp
from jax.experimental import pallas as pl
from jax.experimental.pallas import tpu as pltpu


def _round_up(x, m):
    return ((x + m - 1) // m) * m


def _ce_label_smooth_kernel(logits_ref, labels_ref, out_ref, *,
                            epsilon, num_classes, total_rows, block_rows):
    i = pl.program_id(0)
    row0 = pl.multiple_of(i * block_rows, block_rows)

    x_native = logits_ref[...]                                   # (TN, C) native dtype
    labels = labels_ref[pl.ds(row0, block_rows), :]              # (TN, 1) int32, resident buf

    x = x_native.astype(jnp.float32)                             # f32 working values

    # log-sum-exp (stable); (x - m) only exists inside the fused exp.
    m = jnp.max(x, axis=1, keepdims=True)                        # (TN, 1)
    lse = m + jnp.log(jnp.sum(jnp.exp(x - m), axis=1, keepdims=True))

    # Uniform-smoothing term: sum_c x[n, c] in f32.
    sum_x = jnp.sum(x, axis=1, keepdims=True)                    # (TN, 1)

    # Label term: select on the native-dtype tile (one nonzero per row).
    col_ids = jax.lax.broadcasted_iota(jnp.int32, (block_rows, num_classes), 1)
    label_x = jnp.sum(jnp.where(col_ids == labels, x_native, 0),
                      axis=1, keepdims=True).astype(jnp.float32)  # (TN, 1)

    # Folded algebra: per_row = lse - (1-eps)*x[label] - (eps/C)*sum_x.
    per_row = lse - (1.0 - epsilon) * label_x - (epsilon / num_classes) * sum_x

    # Mask rows past the true batch size (ragged last block). Use where (not
    # multiply) so inf/NaN in padded rows cannot contaminate the sum.
    row_ids = row0 + jax.lax.broadcasted_iota(jnp.int32, (block_rows, 1), 0)
    per_row = jnp.where(row_ids < total_rows, per_row, 0.0)

    out_ref[...] = jnp.sum(per_row).reshape(1, 1, 1)             # per-block partial


def cross_entropy_label_smooth(logits, labels, *, epsilon=0.1, block_rows=None):
    """logits: (N, C) float (f32/bf16), labels: (N,) int. Returns scalar f32."""
    n, c = logits.shape

    itemsize = jnp.dtype(logits.dtype).itemsize
    sublane = max(8, 32 // itemsize)          # 8 for f32, 16 for bf16

    if block_rows is None:
        # Budget: double-buffered native-dtype logits tile (2*itemsize) plus
        # f32 working copy + exp temp + mask (~12 bytes/element).  16 MiB keeps
        # the per-core footprint comfortable on every generation (v7x: 64 MiB
        # physical VMEM, 2 TCs) while still giving multi-MiB DMAs per step.
        vmem_budget = 16 * 1024 * 1024
        bytes_per_row = c * (2 * itemsize + 12)
        block_rows = max(sublane,
                         (vmem_budget // bytes_per_row) // sublane * sublane)
    block_rows = int(min(block_rows, _round_up(n, sublane)))
    block_rows = _round_up(block_rows, sublane)

    num_blocks = pl.cdiv(n, block_rows)
    padded_rows = num_blocks * block_rows

    # Labels: one resident int32 buffer, padded so in-kernel pl.ds slicing
    # never reads out of bounds on the ragged last block.
    labels2d = labels.reshape(n, 1).astype(jnp.int32)
    if padded_rows > n:
        labels2d = jnp.pad(labels2d, ((0, padded_rows - n), (0, 0)))

    kernel = functools.partial(
        _ce_label_smooth_kernel,
        epsilon=float(epsilon),
        num_classes=c,
        total_rows=n,
        block_rows=block_rows,
    )

    partials = pl.pallas_call(
        kernel,
        out_shape=jax.ShapeDtypeStruct((num_blocks, 1, 1), jnp.float32),
        grid_spec=pltpu.PrefetchScalarGridSpec(
            num_scalar_prefetch=0,
            grid=(num_blocks,),
            in_specs=[
                # logits tile, pipelined per grid step
                pl.BlockSpec((block_rows, c), lambda i: (i, 0)),
                # labels: full-array resident buffer, fetched once
                pl.BlockSpec((padded_rows, 1), lambda i: (0, 0)),
            ],
            # independent per-block partial sums (no cross-step carry)
            out_specs=pl.BlockSpec((1, 1, 1), lambda i: (i, 0, 0)),
        ),
        compiler_params=pltpu.CompilerParams(
            dimension_semantics=("parallel",),
            vmem_limit_bytes=40 * 1024 * 1024,
        ),
    )(logits, labels2d)

    return jnp.sum(partials) * (1.0 / n)


def _reference(logits, labels, epsilon=0.1):
    x = logits.astype(jnp.float32)
    log_probs = jax.nn.log_softmax(x, axis=1)
    one_hot = jax.nn.one_hot(labels, x.shape[1], dtype=jnp.float32)
    targets = (1.0 - epsilon) * one_hot + epsilon / x.shape[1]
    return jnp.sum(jnp.mean(-targets * log_probs, axis=0))


if __name__ == "__main__":
    epsilon = 0.1
    key = jax.random.PRNGKey(0)
    k1, k2, k3, k4, k5, k6 = jax.random.split(key, 6)

    # Case 1: f32 logits, batch is an exact multiple of the row block.
    logits_a = jax.random.normal(k1, (8, 128), dtype=jnp.float32)
    labels_a = jax.random.randint(k2, (8,), 0, 128, dtype=jnp.int32)
    got_a = jax.block_until_ready(
        cross_entropy_label_smooth(logits_a, labels_a, epsilon=epsilon))
    ref_a = jax.block_until_ready(_reference(logits_a, labels_a, epsilon))
    assert jnp.allclose(got_a, ref_a, atol=1e-5, rtol=1e-5), (got_a, ref_a)

    # Case 2: ragged batch (12 rows, block_rows=8 -> 2 grid steps, masked tail,
    # multi-block parallel partials).
    logits_b = jax.random.normal(k3, (12, 128), dtype=jnp.float32)
    labels_b = jax.random.randint(k4, (12,), 0, 128, dtype=jnp.int32)
    got_b = jax.block_until_ready(
        cross_entropy_label_smooth(logits_b, labels_b, epsilon=epsilon,
                                   block_rows=8))
    ref_b = jax.block_until_ready(_reference(logits_b, labels_b, epsilon))
    assert jnp.allclose(got_b, ref_b, atol=1e-5, rtol=1e-5), (got_b, ref_b)

    # Case 3: bf16 logits stay bf16 in VMEM (half DMA bytes); label select runs
    # on the packed native-dtype tile, cast only the (TN,1) result to f32.
    logits_c = jax.random.normal(k5, (16, 256), dtype=jnp.float32).astype(
        jnp.bfloat16)
    labels_c = jax.random.randint(k6, (16,), 0, 256, dtype=jnp.int32)
    got_c = jax.block_until_ready(
        cross_entropy_label_smooth(logits_c, labels_c, epsilon=epsilon))
    ref_c = jax.block_until_ready(_reference(logits_c, labels_c, epsilon))
    assert jnp.allclose(got_c, ref_c, atol=1e-4, rtol=1e-4), (got_c, ref_c)

    print("KERNEL_OK")
</pallas_src>

<mosaic_0001>
module attributes {stable_mosaic.version = 11 : i64} {
  func.func @_ce_label_smooth_kernel(%arg0: i32, %arg1: memref<8x128xf32, #tpu.memory_space<vmem>>, %arg2: memref<8x1xi32, #tpu.memory_space<vmem>>, %arg3: memref<1x1x1xf32, #tpu.memory_space<vmem>>) attributes {dimension_semantics = [#tpu.dimension_semantics<parallel>], iteration_bounds = array<i64: 1>, scalar_prefetch = 0 : i64, scratch_operands = 0 : i64, tpu.core_type = #tpu.core_type<tc>, window_params = [{transform_indices = @transform_0, window_bounds = array<i64: 8, 128>}, {pipeline_mode = #tpu.pipeline_mode<synchronous>, transform_indices = @transform_1, window_bounds = array<i64: 8, 1>}, {transform_indices = @transform_2, window_bounds = array<i64: 1, 1, 1>}]} {
    %c8_i32 = arith.constant 8 : i32
    %0 = arith.muli %arg0, %c8_i32 : i32
    %1 = tpu.assume_multiple %0, 8 : i32
    %c0 = arith.constant 0 : index
    %c0_0 = arith.constant 0 : index
    %2 = vector.load %arg1[%c0, %c0_0] : memref<8x128xf32, #tpu.memory_space<vmem>>, vector<8x128xf32>
    %3 = arith.index_cast %1 : i32 to index
    %c0_1 = arith.constant 0 : index
    %4 = vector.load %arg2[%3, %c0_1] : memref<8x1xi32, #tpu.memory_space<vmem>>, vector<8x1xi32>
    %cst = arith.constant dense<0xFF800000> : vector<8xf32>
    %5 = vector.multi_reduction <maximumf>, %2, %cst [1] : vector<8x128xf32> to vector<8xf32>
    %6 = vector.shape_cast %5 : vector<8xf32> to vector<8x1xf32>
    %7 = vector.broadcast %6 : vector<8x1xf32> to vector<8x128xf32>
    %8 = arith.subf %2, %7 : vector<8x128xf32>
    %9 = math.exp %8 : vector<8x128xf32>
    %cst_2 = arith.constant dense<0.000000e+00> : vector<8xf32>
    %10 = vector.multi_reduction <add>, %9, %cst_2 [1] : vector<8x128xf32> to vector<8xf32>
    %11 = vector.shape_cast %10 : vector<8xf32> to vector<8x1xf32>
    %12 = math.log %11 : vector<8x1xf32>
    %13 = arith.addf %6, %12 : vector<8x1xf32>
    %cst_3 = arith.constant dense<0.000000e+00> : vector<8xf32>
    %14 = vector.multi_reduction <add>, %2, %cst_3 [1] : vector<8x128xf32> to vector<8xf32>
    %15 = vector.shape_cast %14 : vector<8xf32> to vector<8x1xf32>
    %16 = tpu.iota {dimensions = array<i32: 1>} : vector<8x128xi32>
    %17 = vector.broadcast %4 : vector<8x1xi32> to vector<8x128xi32>
    %18 = arith.cmpi eq, %16, %17 : vector<8x128xi32>
    %c0_i32 = arith.constant 0 : i32
    %19 = arith.sitofp %c0_i32 : i32 to f32
    %20 = vector.broadcast %19 : f32 to vector<8x128xf32>
    %21 = arith.select %18, %2, %20 : vector<8x128xi1>, vector<8x128xf32>
    %cst_4 = arith.constant dense<0.000000e+00> : vector<8xf32>
    %22 = vector.multi_reduction <add>, %21, %cst_4 [1] : vector<8x128xf32> to vector<8xf32>
    %23 = vector.shape_cast %22 : vector<8xf32> to vector<8x1xf32>
    %cst_5 = arith.constant 0.899999976 : f32
    %24 = vector.broadcast %cst_5 : f32 to vector<8x1xf32>
    %25 = arith.mulf %24, %23 : vector<8x1xf32>
    %26 = arith.subf %13, %25 : vector<8x1xf32>
    %cst_6 = arith.constant 7.812500e-04 : f32
    %27 = vector.broadcast %cst_6 : f32 to vector<8x1xf32>
    %28 = arith.mulf %27, %15 : vector<8x1xf32>
    %29 = arith.subf %26, %28 : vector<8x1xf32>
    %30 = tpu.iota {dimensions = array<i32: 0>} : vector<8x1xi32>
    %31 = vector.broadcast %1 : i32 to vector<8x1xi32>
    %32 = arith.addi %31, %30 : vector<8x1xi32>
    %c8_i32_7 = arith.constant 8 : i32
    %33 = vector.broadcast %c8_i32_7 : i32 to vector<8x1xi32>
    %34 = arith.cmpi slt, %32, %33 : vector<8x1xi32>
    %cst_8 = arith.constant 0.000000e+00 : f32
    %35 = vector.broadcast %cst_8 : f32 to vector<8x1xf32>
    %36 = arith.select %34, %29, %35 : vector<8x1xi1>, vector<8x1xf32>
    %37 = vector.shape_cast %36 : vector<8x1xf32> to vector<1x8x1xf32>
    %cst_9 = arith.constant dense<0.000000e+00> : vector<1xf32>
    %38 = vector.multi_reduction <add>, %37, %cst_9 [1, 2] : vector<1x8x1xf32> to vector<1xf32>
    %39 = vector.shape_cast %38 : vector<1xf32> to vector<1x1x1xf32>
    %40 = vector.extract %39[0, 0, 0] : f32 from vector<1x1x1xf32>
    %41 = vector.broadcast %40 : f32 to vector<1x1x1xf32>
    %c0_10 = arith.constant 0 : index
    %c0_11 = arith.constant 0 : index
    %c0_12 = arith.constant 0 : index
    %42 = vector.load %arg3[%c0_10, %c0_11, %c0_12] : memref<1x1x1xf32, #tpu.memory_space<vmem>>, vector<1x1x1xf32>
    tpu.vector_store %arg3[%c0_10, %c0_11, %c0_12], %41 {strides = array<i32>} : memref<1x1x1xf32, #tpu.memory_space<vmem>>, vector<1x1x1xf32>,
    return
  }
  func.func @transform_0(%arg0: i32) -> (i32, i32) {
    %c0_i32 = arith.constant 0 : i32
    %c0_i32_0 = arith.constant 0 : i32
    return %arg0, %c0_i32 : i32, i32
  }
  func.func @transform_1(%arg0: i32) -> (i32, i32) {
    %c0_i32 = arith.constant 0 : i32
    %c0_i32_0 = arith.constant 0 : i32
    %c0_i32_1 = arith.constant 0 : i32
    return %c0_i32, %c0_i32_0 : i32, i32
  }
  func.func @transform_2(%arg0: i32) -> (i32, i32, i32) {
    %c0_i32 = arith.constant 0 : i32
    %c0_i32_0 = arith.constant 0 : i32
    %c0_i32_1 = arith.constant 0 : i32
    return %arg0, %c0_i32, %c0_i32_0 : i32, i32, i32
  }
}

</mosaic_0001>

<bundles_post_ra>
// kernel: tpu_custom_call.1
= control target key start
LH: loop header
LB: loop body
LE: loop exit
PB: predicated region body
PF: predicated region fallthrough
CT: control target
= control target key end

     0   :  { %s132_s0 = inlined_call_operand.vmem [shape: f32[8,128], index: 0, kind: input, shape index: {}]   ;;  %s133_s1 = inlined_call_operand.vmem [shape: s32[8,1], index: 1, kind: input, shape index: {}]   ;;  %s134_s2 = inlined_call_operand.hbm [shape: f32[1,1,1], index: 2, kind: output, shape index: {}]  }
   0x1   :  { %v13_v0 = vld [vmem:[%s132_s0] sm:$0xff] }
   0x2   :  { %7 = vsyncpa [#allocation3], 0  ;;  %16 = vmax.xlane.f32.xlu0 %v13_v0  ;;  %v106_v1 = vmov 0   ;;  %v15_v2 = vld [vmem:[%s133_s1] sm:$0xff]  ;;  %v28_v6 = vlaneseq  ;;  %vm47_vm1 = vcmask 7168   ;;  %s107_s0 = smov [#allocation2]  }
   0x3   :  { %79 = vset.pattern.permute.xlu0 %v106_v1  ;;  %s67_s1 = sshll.u32 %s107_s0, 4  ;;  %vm59_vm2 = vcmask 0   ;;  %s68_s1 = int_to_ptr.vmem [resolvable:$true] %s67_s1 }
   0x4   :  { %v29_v7 = vand.u32 127, %v28_v6  ;;  %s84_s14 = scalar_lea.vmem %s68_s1, 16  ;;  %s88_s15 = scalar_lea.vmem %s68_s1, 32 }
   0x5   :  { %p85_p0 = scmp.ne.s32.totalorder %s68_s1, %s84_s14  ;;  %p89_p1 = scmp.lt.s32.totalorder %s68_s1, %s68_s1 }
   0x6   :  { %p90_p2 = scmp.lt.s32.totalorder %s88_s15, %s84_s14 }
   0x8   :  { %p91_p3 = por %p90_p2, %p89_p1 }
   0xa   :  { %p92_p4 = pnand %p91_p3, %p85_p0 }
  0x18   :  { %31 = vperm.xlu0 %79, %v15_v2  }
  0x8b   :  { %v17_v3 = vpop.xlane.xlu0 %16 }
  0x8c   :  { %v18_v4 = vsub.f32 %v13_v0, %v17_v3 }
  0x8e   :  { %v19_v5 = vmul.f32 1.442695, %v18_v4 }
  0x90   :  { %80 = vpow2.f32 %v19_v5 }
  0x93   :  { %v32_v8 = vpop.permute.xlu0 %31 }
  0x94   :  { %vm33_vm0 = vcmp.eq.s32.totalorder %v29_v7, %v32_v8 }
  0x95   :  { %v34_v10 = vsel %vm33_vm0, %v13_v0, 0.0 }
  0x9d   :  { %v81_v9 = vpop.eup %80 }
  0x9e   :  { %21 = vadd.xlane.f32.xlu1 %v81_v9 }
  0xa2   :  { %35 = vadd.xlane.f32.xlu1 %v34_v10 }
  0xa6   :  { %26 = vadd.xlane.f32.xlu1 %v13_v0 }
 0x127   :  { %v22_v11 = vpop.xlane.xlu1 %21 }
 0x128   :  { %82 = vlog2.f32 %v22_v11 }
 0x12b   :  { %v36_v12 = vpop.xlane.xlu1 %35 }
 0x12c   :  { %v37_v17 = vmul.f32 0.9, %v36_v12 }
 0x12f   :  { %v27_v14 = vpop.xlane.xlu1 %26 }
 0x130   :  { %v39_v18 = vmul.f32 0.00078125, %v27_v14 }
 0x135   :  { %v83_v13 = vpop.eup %82 }
 0x136   :  { %v24_v15 = vmul.f32 0.6931472, %v83_v13 }
 0x138   :  { %v25_v16 = vadd.f32 %v24_v15, %v17_v3 }
 0x13a   :  { %v38_v19 = vsub.f32 %v25_v16, %v37_v17 }
 0x13c   :  { %v40_v20 = vsub.f32 %v38_v19, %v39_v18 }
 0x13e   :  { %v48_v21 = vsel %vm47_vm1, %v40_v20, 0.0 }
 0x13f   :  { %49 = vadd.xlane.f32.xlu1 %v48_v21 }
 0x1c8   :  { %v50_v22 = vpop.xlane.xlu1 %49 }
 0x1c9   :  { %v51_v23 = vrot.slane %v50_v22, 4 }
 0x1cb   :  { %v52_v24 = vadd.f32 %v51_v23, %v50_v22 }
 0x1cd   :  { %v53_v25 = vrot.slane %v52_v24, 2 }
 0x1cf   :  { %v54_v26 = vadd.f32 %v53_v25, %v52_v24 }
 0x1d1   :  { %v55_v27 = vrot.slane %v54_v26, 1 }
 0x1d3   :  { %v56_v28 = vadd.f32 %v55_v27, %v54_v26 }
 0x1d5   :  { %75 = vpush %v56_v28 }
 0x206   :  { %s76_s13 = spop %75 }
 0x207   :  { %v58_v29 = vstv %s76_s13 }
 0x208   :  { %60 = vst.msk [vmem:[#allocation2] sm:$0x1] %vm59_vm2, %v58_v29 }
 0x209   :  { %95 = shalt.err (!%p92_p4)
}
 0x20a   :  { %70 = dma.vmem_to_hbm [thread:$0]  %s68_s1, 16, %s134_s2, [#allocation3]  }
 0x20b   :  { %104 = dma.done.wait [#allocation3], 16  }
 0x20c   :  { %105 = vsyncadd [#allocation3], 4294967280 }
 0x20d   :  { %74 = vsyncpa [#allocation3], 1 }

</bundles_post_ra>
